<compile_context>
chip_gen: v7x
topology: tpu7x:2x2x1
jax: 0.10.0
libtpu: 0.0.40
codegen_flags: <defaults>
</compile_context>

<pallas_src>
import functools

import jax
import jax.numpy as jnp
import numpy as np
from jax.experimental import pallas as pl
from jax.experimental.pallas import tpu as pltpu


def _ce_kernel(x_ref, t_ref, w_ref, num_ref, den_ref, *,
               j_per_split, n_pixels, assume_onehot):
    """One tile of TL pixels (all C classes on sublanes); accumulates per-lane partials."""
    j = pl.program_id(2)  # pixel-chunk index within the current (image, pixel-split)

    @pl.when(j == 0)
    def _init():
        num_ref[...] = jnp.zeros_like(num_ref)
        den_ref[...] = jnp.zeros_like(den_ref)

    x = x_ref[...].astype(jnp.float32)      # (C, TL) logits (upcast in VMEM only)
    t = t_ref[...].astype(jnp.float32)      # (C, TL) one-hot / soft target
    w = w_ref[...]                          # (1, C)  lane-dense class weights (f32)

    C, TL = x.shape
    ones = jnp.ones((1, C), jnp.float32)
    hi = jax.lax.Precision.HIGHEST          # fp32 contract precision on the MXU

    if assume_onehot:
        sel = t                             # strict one-hot: selection mask IS the target
    else:
        # torch.argmax(dim=1) with first-occurrence tie-breaking (XLU max + min).
        cidx = jax.lax.broadcasted_iota(jnp.int32, (C, TL), 0)
        t_max = jnp.max(t, axis=0, keepdims=True)                               # (1, TL)
        y = jnp.min(jnp.where(t == t_max, cidx, C), axis=0, keepdims=True)      # (1, TL)
        sel = (cidx == y).astype(jnp.float32)                                   # (C, TL)

    # Sum-over-C contractions on the MXU (idle otherwise); exact for 0/1 selection masks.
    picked = jnp.dot(ones, x * sel, preferred_element_type=jnp.float32, precision=hi)  # x[y]
    w_row = jnp.dot(w, sel, preferred_element_type=jnp.float32, precision=hi)          # w[y]

    m = jnp.max(x, axis=0, keepdims=True)                                                # XLU
    sum_exp = jnp.dot(ones, jnp.exp(x - m), preferred_element_type=jnp.float32, precision=hi)
    lse = m + jnp.log(sum_exp)                                                           # (1, TL)

    num_c = w_row * (lse - picked)
    den_c = w_row

    if n_pixels is not None:
        # Ragged last tile: zero out-of-range lanes' contributions (also neutralizes any
        # garbage/NaN read past the end of the image, which stays lane-local above).
        p = pl.program_id(1)
        pix = (p * j_per_split + j) * TL + jax.lax.broadcasted_iota(jnp.int32, (1, TL), 1)
        valid = pix < n_pixels
        num_c = jnp.where(valid, num_c, 0.0)
        den_c = jnp.where(valid, den_c, 0.0)

    # Lane-wide elementwise accumulation; the tiny final reduce + divide happens outside.
    num_ref[...] += num_c
    den_ref[...] += den_c


@functools.partial(jax.jit, static_argnames=("assume_onehot", "max_tl"))
def ce_with_logits(logits_nchw, target_nchw, class_weights, *,
                   assume_onehot=False, max_tl=131072):
    """Weighted cross-entropy with logits; target is one-hot / soft over dim=1 (NCHW).

    Inputs are consumed in their given dtype (bf16/f32/...); upcast happens in VMEM.
    `assume_onehot=True` enables the strict-one-hot fast path (skips argmax machinery).
    """
    N, C, H, W = logits_nchw.shape
    L = H * W

    # Free reshapes: class dim stays on the sublane axis, pixels become the lane axis.
    x = logits_nchw.reshape(N, C, L)
    t = target_nchw.reshape(N, C, L)
    w = class_weights.reshape(1, C).astype(jnp.float32)   # lane-dense weight row

    # --- C-aware tile sizing against an explicit VMEM budget (safe on v5e / v6e / v7x). ---
    VMEM_LIMIT = 32 * 1024 * 1024   # raises v5e's 16 MiB default; safe on v7x's 64 MiB physical
    BUDGET = 20 * 1024 * 1024       # double-buffered inputs + outputs must fit under the limit
    per_col = 2 * C * (x.dtype.itemsize + t.dtype.itemsize) + 2 * 2 * 4   # bytes per pixel column
    tl_cap = min(max_tl, max(128, BUDGET // per_col))
    if L <= tl_cap:
        tl = L                       # whole image per block (full-dim block is always legal)
    else:
        tl = tl_cap - tl_cap % 128
        # Prefer a 128-multiple divisor of L (no ragged tail) if it is not much smaller.
        for cand in range(tl, 127, -128):
            if L % cand == 0:
                if cand >= tl // 2:
                    tl = cand
                break

    grid_j_total = -(-L // tl)
    needs_mask = (L % tl) != 0

    # Two-way pixel split so both v7x TensorCores get work when N is odd / N == 1.
    P = 2 if (not needs_mask and N % 2 == 1 and grid_j_total % 2 == 0) else 1
    J = grid_j_total // P

    kernel = functools.partial(
        _ce_kernel,
        j_per_split=J,
        n_pixels=(L if needs_mask else None),
        assume_onehot=assume_onehot,
    )

    num_p, den_p = pl.pallas_call(
        kernel,
        out_shape=(
            jax.ShapeDtypeStruct((N * P, 1, tl), jnp.float32),   # per-(image,split) per-lane num
            jax.ShapeDtypeStruct((N * P, 1, tl), jnp.float32),   # per-(image,split) per-lane den
        ),
        grid_spec=pltpu.PrefetchScalarGridSpec(
            num_scalar_prefetch=0,
            grid=(N, P, J),
            in_specs=[
                pl.BlockSpec((None, C, tl), lambda n, p, j: (n, 0, p * J + j)),  # logits (C, TL)
                pl.BlockSpec((None, C, tl), lambda n, p, j: (n, 0, p * J + j)),  # target (C, TL)
                pl.BlockSpec((1, C), lambda n, p, j: (0, 0)),                    # weights (1, C)
            ],
            out_specs=[
                pl.BlockSpec((None, 1, tl), lambda n, p, j: (n * P + p, 0, 0)),
                pl.BlockSpec((None, 1, tl), lambda n, p, j: (n * P + p, 0, 0)),
            ],
        ),
        compiler_params=pltpu.CompilerParams(
            dimension_semantics=("parallel", "parallel", "arbitrary"),
            vmem_limit_bytes=VMEM_LIMIT,
        ),
    )(x, t, w)

    # Tiny final reduction + divide in plain JAX (f32, negligible cost).
    return jnp.sum(num_p) / jnp.sum(den_p)


def _reference(logits_nchw, target_nchw, class_weights):
    """Pure-JAX reference matching nn.CrossEntropyLoss(weight=w)(input, target.argmax(1))."""
    N, C, H, W = logits_nchw.shape
    x = jnp.transpose(logits_nchw, (0, 2, 3, 1)).reshape(-1, C).astype(jnp.float32)
    t = jnp.transpose(target_nchw, (0, 2, 3, 1)).reshape(-1, C).astype(jnp.float32)
    y = jnp.argmax(t, axis=-1)
    lse = jax.nn.logsumexp(x, axis=-1)
    picked = jnp.take_along_axis(x, y[:, None], axis=-1)[:, 0]
    w = class_weights.astype(jnp.float32)[y]
    return jnp.sum(w * (lse - picked)) / jnp.sum(w)


def _make_case(key, N, C, H, W, t_dtype):
    k1, k2 = jax.random.split(key)
    logits = jax.random.normal(k1, (N, C, H, W), dtype=jnp.float32)
    cls = jax.random.randint(k2, (N, H, W), 0, C)
    # One-hot target in NCHW layout (what target.argmax(dim=1) expects); low-precision dtype
    # is passed straight through to the kernel (no wrapper-side cast / extra HBM pass).
    target = jnp.transpose(jax.nn.one_hot(cls, C, dtype=t_dtype), (0, 3, 1, 2))
    return logits, target


if __name__ == "__main__":
    key = jax.random.PRNGKey(0)
    k1, k2, k3 = jax.random.split(key, 3)
    class_weights = jnp.array([1.0, 2.0, 0.5, 1.5], dtype=jnp.float32)

    # Case 1: module-like shapes; bf16 one-hot target streamed as-is. Both the exact-argmax
    # path and the strict-one-hot fast path are checked.
    logits, target = _make_case(k1, 2, 4, 16, 16, jnp.bfloat16)
    ref = _reference(logits, target, class_weights)
    loss = jax.block_until_ready(ce_with_logits(logits, target, class_weights))
    np.testing.assert_allclose(np.asarray(loss), np.asarray(ref), rtol=1e-5, atol=1e-5)
    loss_oh = jax.block_until_ready(
        ce_with_logits(logits, target, class_weights, assume_onehot=True))
    np.testing.assert_allclose(np.asarray(loss_oh), np.asarray(ref), rtol=1e-5, atol=1e-5)

    # Case 2: ragged pixel tail (L=400 with forced 128-pixel tiles) -> in-kernel tail masking.
    logits, target = _make_case(k2, 1, 4, 20, 20, jnp.float32)
    ref = _reference(logits, target, class_weights)
    loss = jax.block_until_ready(ce_with_logits(logits, target, class_weights, max_tl=128))
    np.testing.assert_allclose(np.asarray(loss), np.asarray(ref), rtol=1e-5, atol=1e-5)

    # Case 3: N=1 with forced small tiles -> two-way pixel split (both v7x cores busy).
    logits, target = _make_case(k3, 1, 4, 32, 32, jnp.bfloat16)
    ref = _reference(logits, target, class_weights)
    loss = jax.block_until_ready(ce_with_logits(logits, target, class_weights, max_tl=256))
    np.testing.assert_allclose(np.asarray(loss), np.asarray(ref), rtol=1e-5, atol=1e-5)

    print("KERNEL_OK")
</pallas_src>

<mosaic_0001>
module attributes {stable_mosaic.version = 11 : i64} {
  func.func @_ce_kernel(%arg0: i32, %arg1: i32, %arg2: i32, %arg3: memref<1x4x256xf32, #tpu.memory_space<vmem>>, %arg4: memref<1x4x256xbf16, #tpu.memory_space<vmem>>, %arg5: memref<1x4xf32, #tpu.memory_space<vmem>>, %arg6: memref<1x1x256xf32, #tpu.memory_space<vmem>>, %arg7: memref<1x1x256xf32, #tpu.memory_space<vmem>>) attributes {dimension_semantics = [#tpu.dimension_semantics<parallel>, #tpu.dimension_semantics<parallel>, #tpu.dimension_semantics<arbitrary>], iteration_bounds = array<i64: 2, 1, 1>, scalar_prefetch = 0 : i64, scratch_operands = 0 : i64, tpu.core_type = #tpu.core_type<tc>, window_params = [{transform_indices = @transform_0, window_bounds = array<i64: 1, 4, 256>}, {transform_indices = @transform_1, window_bounds = array<i64: 1, 4, 256>}, {pipeline_mode = #tpu.pipeline_mode<synchronous>, transform_indices = @transform_2, window_bounds = array<i64: 1, 4>}, {transform_indices = @transform_3, window_bounds = array<i64: 1, 1, 256>}, {transform_indices = @transform_4, window_bounds = array<i64: 1, 1, 256>}]} {
    %c0_i32 = arith.constant 0 : i32
    %0 = arith.cmpi eq, %arg2, %c0_i32 : i32
    %1 = arith.extui %0 : i1 to i32
    %c0_i32_0 = arith.constant 0 : i32
    %2 = arith.cmpi ne, %1, %c0_i32_0 : i32
    scf.if %2 {
      %cst_26 = arith.constant 0.000000e+00 : f32
      %48 = vector.broadcast %cst_26 : f32 to vector<1x256xf32>
      %c0_27 = arith.constant 0 : index
      %c0_28 = arith.constant 0 : index
      %c0_29 = arith.constant 0 : index
      %49 = vector.load %arg6[%c0_27, %c0_28, %c0_29] : memref<1x1x256xf32, #tpu.memory_space<vmem>>, vector<1x1x256xf32>
      %50 = vector.shape_cast %49 : vector<1x1x256xf32> to vector<1x256xf32>
      %51 = vector.shape_cast %48 : vector<1x256xf32> to vector<1x1x256xf32>
      tpu.vector_store %arg6[%c0_27, %c0_28, %c0_29], %51 {strides = array<i32>} : memref<1x1x256xf32, #tpu.memory_space<vmem>>, vector<1x1x256xf32>,
      %cst_30 = arith.constant 0.000000e+00 : f32
      %52 = vector.broadcast %cst_30 : f32 to vector<1x256xf32>
      %c0_31 = arith.constant 0 : index
      %c0_32 = arith.constant 0 : index
      %c0_33 = arith.constant 0 : index
      %53 = vector.load %arg7[%c0_31, %c0_32, %c0_33] : memref<1x1x256xf32, #tpu.memory_space<vmem>>, vector<1x1x256xf32>
      %54 = vector.shape_cast %53 : vector<1x1x256xf32> to vector<1x256xf32>
      %55 = vector.shape_cast %52 : vector<1x256xf32> to vector<1x1x256xf32>
      tpu.vector_store %arg7[%c0_31, %c0_32, %c0_33], %55 {strides = array<i32>} : memref<1x1x256xf32, #tpu.memory_space<vmem>>, vector<1x1x256xf32>,
    } else {
    }
    %c0 = arith.constant 0 : index
    %c0_1 = arith.constant 0 : index
    %c0_2 = arith.constant 0 : index
    %3 = vector.load %arg3[%c0, %c0_1, %c0_2] : memref<1x4x256xf32, #tpu.memory_space<vmem>>, vector<1x4x256xf32>
    %4 = vector.shape_cast %3 : vector<1x4x256xf32> to vector<4x256xf32>
    %c0_3 = arith.constant 0 : index
    %c0_4 = arith.constant 0 : index
    %c0_5 = arith.constant 0 : index
    %5 = vector.load %arg4[%c0_3, %c0_4, %c0_5] : memref<1x4x256xbf16, #tpu.memory_space<vmem>>, vector<1x4x256xbf16>
    %6 = vector.shape_cast %5 : vector<1x4x256xbf16> to vector<4x256xbf16>
    %7 = arith.extf %6 : vector<4x256xbf16> to vector<4x256xf32>
    %c0_6 = arith.constant 0 : index
    %c0_7 = arith.constant 0 : index
    %8 = vector.load %arg5[%c0_6, %c0_7] : memref<1x4xf32, #tpu.memory_space<vmem>>, vector<1x4xf32>
    %cst = arith.constant 1.000000e+00 : f32
    %9 = vector.broadcast %cst : f32 to vector<1x4xf32>
    %10 = tpu.iota {dimensions = array<i32: 0>} : vector<4x256xi32>
    %cst_8 = arith.constant dense<0xFF800000> : vector<256xf32>
    %11 = vector.multi_reduction <maximumf>, %7, %cst_8 [0] : vector<4x256xf32> to vector<256xf32>
    %12 = vector.shape_cast %11 : vector<256xf32> to vector<1x256xf32>
    %13 = vector.broadcast %12 : vector<1x256xf32> to vector<4x256xf32>
    %14 = arith.cmpf oeq, %7, %13 : vector<4x256xf32>
    %c4_i32 = arith.constant 4 : i32
    %15 = vector.broadcast %c4_i32 : i32 to vector<4x256xi32>
    %16 = arith.select %14, %10, %15 : vector<4x256xi1>, vector<4x256xi32>
    %cst_9 = arith.constant dense<2147483647> : vector<256xi32>
    %17 = vector.multi_reduction <minsi>, %16, %cst_9 [0] : vector<4x256xi32> to vector<256xi32>
    %18 = vector.shape_cast %17 : vector<256xi32> to vector<1x256xi32>
    %19 = vector.broadcast %18 : vector<1x256xi32> to vector<4x256xi32>
    %20 = arith.cmpi eq, %10, %19 : vector<4x256xi32>
    %21 = arith.extui %20 : vector<4x256xi1> to vector<4x256xi32>
    %22 = arith.sitofp %21 : vector<4x256xi32> to vector<4x256xf32>
    %23 = arith.mulf %4, %22 : vector<4x256xf32>
    %cst_10 = arith.constant dense<0.000000e+00> : vector<1x256xf32>
    %24 = tpu.matmul %9, %23, %cst_10 {dimension_numbers = #tpu.dot_dimension_numbers<[1], [0], [0], [1], [0, 0, 1, 1], [], []>, precision = #tpu.contract_precision<fp32>} : vector<1x4xf32>, vector<4x256xf32>, vector<1x256xf32> -> vector<1x256xf32>
    %cst_11 = arith.constant dense<0.000000e+00> : vector<1x256xf32>
    %25 = tpu.matmul %8, %22, %cst_11 {dimension_numbers = #tpu.dot_dimension_numbers<[1], [0], [0], [1], [0, 0, 1, 1], [], []>, precision = #tpu.contract_precision<fp32>} : vector<1x4xf32>, vector<4x256xf32>, vector<1x256xf32> -> vector<1x256xf32>
    %cst_12 = arith.constant dense<0xFF800000> : vector<256xf32>
    %26 = vector.multi_reduction <maximumf>, %4, %cst_12 [0] : vector<4x256xf32> to vector<256xf32>
    %27 = vector.shape_cast %26 : vector<256xf32> to vector<1x256xf32>
    %28 = vector.broadcast %27 : vector<1x256xf32> to vector<4x256xf32>
    %29 = arith.subf %4, %28 : vector<4x256xf32>
    %30 = math.exp %29 : vector<4x256xf32>
    %cst_13 = arith.constant dense<0.000000e+00> : vector<1x256xf32>
    %31 = tpu.matmul %9, %30, %cst_13 {dimension_numbers = #tpu.dot_dimension_numbers<[1], [0], [0], [1], [0, 0, 1, 1], [], []>, precision = #tpu.contract_precision<fp32>} : vector<1x4xf32>, vector<4x256xf32>, vector<1x256xf32> -> vector<1x256xf32>
    %32 = math.log %31 : vector<1x256xf32>
    %33 = arith.addf %27, %32 : vector<1x256xf32>
    %34 = arith.subf %33, %24 : vector<1x256xf32>
    %35 = arith.mulf %25, %34 : vector<1x256xf32>
    %c0_14 = arith.constant 0 : index
    %c0_15 = arith.constant 0 : index
    %c0_16 = arith.constant 0 : index
    %36 = vector.load %arg6[%c0_14, %c0_15, %c0_16] : memref<1x1x256xf32, #tpu.memory_space<vmem>>, vector<1x1x256xf32>
    %37 = vector.shape_cast %36 : vector<1x1x256xf32> to vector<1x256xf32>
    %38 = arith.addf %37, %35 : vector<1x256xf32>
    %c0_17 = arith.constant 0 : index
    %c0_18 = arith.constant 0 : index
    %c0_19 = arith.constant 0 : index
    %39 = vector.load %arg6[%c0_17, %c0_18, %c0_19] : memref<1x1x256xf32, #tpu.memory_space<vmem>>, vector<1x1x256xf32>
    %40 = vector.shape_cast %39 : vector<1x1x256xf32> to vector<1x256xf32>
    %41 = vector.shape_cast %38 : vector<1x256xf32> to vector<1x1x256xf32>
    tpu.vector_store %arg6[%c0_17, %c0_18, %c0_19], %41 {strides = array<i32>} : memref<1x1x256xf32, #tpu.memory_space<vmem>>, vector<1x1x256xf32>,
    %c0_20 = arith.constant 0 : index
    %c0_21 = arith.constant 0 : index
    %c0_22 = arith.constant 0 : index
    %42 = vector.load %arg7[%c0_20, %c0_21, %c0_22] : memref<1x1x256xf32, #tpu.memory_space<vmem>>, vector<1x1x256xf32>
    %43 = vector.shape_cast %42 : vector<1x1x256xf32> to vector<1x256xf32>
    %44 = arith.addf %43, %25 : vector<1x256xf32>
    %c0_23 = arith.constant 0 : index
    %c0_24 = arith.constant 0 : index
    %c0_25 = arith.constant 0 : index
    %45 = vector.load %arg7[%c0_23, %c0_24, %c0_25] : memref<1x1x256xf32, #tpu.memory_space<vmem>>, vector<1x1x256xf32>
    %46 = vector.shape_cast %45 : vector<1x1x256xf32> to vector<1x256xf32>
    %47 = vector.shape_cast %44 : vector<1x256xf32> to vector<1x1x256xf32>
    tpu.vector_store %arg7[%c0_23, %c0_24, %c0_25], %47 {strides = array<i32>} : memref<1x1x256xf32, #tpu.memory_space<vmem>>, vector<1x1x256xf32>,
    return
  }
  func.func @transform_0(%arg0: i32, %arg1: i32, %arg2: i32) -> (i32, i32, i32) {
    %c1_i32 = arith.constant 1 : i32
    %0 = arith.muli %arg1, %c1_i32 : i32
    %1 = arith.addi %0, %arg2 : i32
    %c0_i32 = arith.constant 0 : i32
    %c0_i32_0 = arith.constant 0 : i32
    return %arg0, %c0_i32, %1 : i32, i32, i32
  }
  func.func @transform_1(%arg0: i32, %arg1: i32, %arg2: i32) -> (i32, i32, i32) {
    %c1_i32 = arith.constant 1 : i32
    %0 = arith.muli %arg1, %c1_i32 : i32
    %1 = arith.addi %0, %arg2 : i32
    %c0_i32 = arith.constant 0 : i32
    %c0_i32_0 = arith.constant 0 : i32
    return %arg0, %c0_i32, %1 : i32, i32, i32
  }
  func.func @transform_2(%arg0: i32, %arg1: i32, %arg2: i32) -> (i32, i32) {
    %c0_i32 = arith.constant 0 : i32
    %c0_i32_0 = arith.constant 0 : i32
    %c0_i32_1 = arith.constant 0 : i32
    return %c0_i32, %c0_i32_0 : i32, i32
  }
  func.func @transform_3(%arg0: i32, %arg1: i32, %arg2: i32) -> (i32, i32, i32) {
    %c1_i32 = arith.constant 1 : i32
    %0 = arith.muli %arg0, %c1_i32 : i32
    %1 = arith.addi %0, %arg1 : i32
    %c0_i32 = arith.constant 0 : i32
    %c0_i32_0 = arith.constant 0 : i32
    %c0_i32_1 = arith.constant 0 : i32
    return %1, %c0_i32, %c0_i32_0 : i32, i32, i32
  }
  func.func @transform_4(%arg0: i32, %arg1: i32, %arg2: i32) -> (i32, i32, i32) {
    %c1_i32 = arith.constant 1 : i32
    %0 = arith.muli %arg0, %c1_i32 : i32
    %1 = arith.addi %0, %arg1 : i32
    %c0_i32 = arith.constant 0 : i32
    %c0_i32_0 = arith.constant 0 : i32
    %c0_i32_1 = arith.constant 0 : i32
    return %1, %c0_i32, %c0_i32_0 : i32, i32, i32
  }
}

</mosaic_0001>

<bundles_post_ra>
// kernel: ce_with_logits.1
= control target key start
LH: loop header
LB: loop body
LE: loop exit
PB: predicated region body
PF: predicated region fallthrough
CT: control target
= control target key end

     0   :  { %s2154_s15 = smov 0   ;;  %s2156_s16 = smov 0   ;;  %s2363_s0 = inlined_call_operand.vmem [shape: f32[2,4,256], index: 0, kind: input, shape index: {}]   ;;  %s2364_s1 = inlined_call_operand.vmem [shape: bf16[2,4,256], index: 1, kind: input, shape index: {}]   ;;  %s2365_s2 = inlined_call_operand.vmem [shape: f32[1,4], index: 2, kind: input, shape index: {}]   ;;  %s2366_s3 = inlined_call_operand.vmem [shape: f32[2,1,256], index: 3, kind: output, shape index: {0}]   ;;  %s2367_s4 = inlined_call_operand.vmem [shape: f32[2,1,256], index: 4, kind: output, shape index: {1}]  }
   0x1   :  { %s2158_s17 = smov 0  }
   0x2 LB: > { %s34_s18 = sadd.s32 1, %s2118_s16  ;;  %p2009_p0 = scmp.ge.s32.totalorder %s2122_s17, 1  ;;  %s2122_s17 = sphi %s2158_s17, %s15_s17   ;;  %s2118_s16 = sphi %s2156_s16, %s2371_s16   ;;  %s2114_s15 = sphi %s2154_s15, %s2370_s15  }
   0x3   : > { %p36_p1 = scmp.ge.s32.totalorder %s34_s18, 2  ;;  %p220_p2 = scmp.lt.s32.totalorder %s2122_s17, 3 }
   0x5   : > { %s2373_s18 = smov (%p36_p1, %s34_s18), 0  ;;  %p221_p3 = pnand %p2009_p0, %p220_p2 }
   0x6   : > { %p268_p4 = scmp.lt.s32.totalorder (!%p221_p3), %s2114_s15, 1  ;;  %v2124_v0 = vmov (!%p221_p3), 0.0   ;;  %vm321_vm0 = vcmask (!%p221_p3), 1043456   ;;  %v306_v13 = vlaneseq (!%p221_p3)  ;;  %v2125_v15 = vmov (!%p221_p3), 839922192  }
   0x7   : > { %224 = sbr.rel (%p221_p3) target bundleno = 369 (0x171), region = 32  ;;  %457 = vmatprep.mubr.f32.mxu1 (!%p221_p3), %v2124_v0  ;;  %694 = vmatprep.mubr.f32.mxu0 (!%p221_p3), %v2124_v0  ;;  %v342_v16 = vunpack.c.l.s4 (!%p221_p3), %v2125_v15  ;;  %vm383_vm4 = vcmask (!%p221_p3), 31744   ;;  %v2126_v57 = vmov (!%p221_p3), 0  }
   0x8   : > { %v2194_v25 = vshrl.u32 (!%p221_p3), %v306_v13, 7  ;;  %v385_v58 = vsel (!%p221_p3), %vm383_vm4, 1.0, %v2126_v57  ;;  %vm2329_vm11 = vcmp.lt.s32.totalorder (!%p221_p3), %v306_v13, 256 }
   0x9   : > { %v343_v26 = vunpack.c.0.s8 (!%p221_p3), %v342_v16  ;;  %v2208_v62 = vsub.f32 (!%p221_p3), %v385_v58, %v385_v58 }
   0xb   : > { %v346_v34 = vsub.s32 (!%p221_p3), %v343_v26, %v2194_v25 }
   0xd   : > { %v347_v40 = vrot.slane (!%p221_p3), %v2194_v25, %v346_v34 }
   0xe   : > { %s2375_s15 = smov (!%p268_p4, %s2114_s15), 1 }
   0xf   : > { %s2032_s19 = sshll.u32 %s2375_s15, 3  ;;  %s2033_s20 = sshll.u32 %s2375_s15, 2 }
  0x10   : > { %s275_s23 = scalar_lea.vmem %s2363_s0, %s2032_s19  ;;  %s287_s26 = scalar_lea.vmem %s2364_s1, %s2033_s20 }
  0x11   : > { %v2184_v1 = vld [vmem:[%s275_s23] sm:$0xff]  ;;  %s2014_s29 = sshll.u32 %s2375_s15, 1 }
  0x12   : > { %v313_v2 = vld [vmem:[%s287_s26] sm:$0xf]  ;;  %v1329_v4 = vcombine.high %v2184_v1, %v2184_v1  ;;  %v1331_v5 = vsel %vm321_vm0, %v2184_v1, -inf  ;;  %s300_s6 = scalar_lea.vmem %s2367_s4, %s2014_s29  ;;  %s2339_s9 = scalar_lea.vmem %s2366_s3, %s2014_s29 }
  0x13   : > { %v314_v3 = vunpack.c.l.bf16 %v313_v2  ;;  %v1332_v6 = vrot.slane %v1331_v5, 4  ;;  %311 = vst.msk [vmem:[%s300_s6] sm:$0x3] %vm2329_vm11, %v2124_v0  ;;  %310 = vst.msk [vmem:[%s2339_s9] sm:$0x3] %vm2329_vm11, %v2124_v0 }
  0x14   : > { %v1338_v9 = vsel %vm321_vm0, %v1329_v4, -inf  ;;  %v2219_v4 = vand.u32 4294901760, %v2208_v62 }
  0x15   : > { %v319_v7 = vcombine.high %v314_v3, %v314_v3  ;;  %v322_v8 = vsel %vm321_vm0, %v314_v3, -inf  ;;  %v1333_v11 = vmax.f32 %v1331_v5, %v1332_v6  ;;  %v1339_v12 = vrot.slane %v1338_v9, 4 }
  0x16   : > { %v323_v10 = vrot.slane %v322_v8, 4 }
  0x17   : > { %v329_v14 = vsel %vm321_vm0, %v319_v7, -inf  ;;  %v1334_v19 = vrot.slane %v1333_v11, 2  ;;  %v1340_v20 = vmax.f32 %v1338_v9, %v1339_v12 }
  0x18   : > { %v324_v17 = vmax.f32 %v322_v8, %v323_v10  ;;  %v330_v18 = vrot.slane %v329_v14, 4  ;;  %v461_v8 = vsub.f32 %v2208_v62, %v2219_v4 }
  0x19   : > { %v1335_v23 = vmax.f32 %v1333_v11, %v1334_v19  ;;  %v1341_v24 = vrot.slane %v1340_v20, 2 }
  0x1a   : > { %v325_v21 = vrot.slane %v324_v17, 2  ;;  %v331_v22 = vmax.f32 %v329_v14, %v330_v18  ;;  %v315_v14 = vld [vmem:[%s2365_s2] sm:$0x1]  ;;  %v2231_v18 = vand.u32 4294901760, %v461_v8 }
  0x1b   : > { %v1336_v29 = vrot.slane %v1335_v23, 1  ;;  %v1342_v30 = vmax.f32 %v1340_v20, %v1341_v24  ;;  %v857_v19 = vsel %vm383_vm4, %v315_v14, 0 }
  0x1c   : > { %v326_v27 = vmax.f32 %v324_v17, %v325_v21  ;;  %v332_v28 = vrot.slane %v331_v22, 2 }
  0x1d   : > { %v1343_v33 = vrot.slane %v1342_v30, 1  ;;  %v2197_v35 = vmax.f32 %v1335_v23, %v1336_v29 }
  0x1e   : > { %v327_v31 = vrot.slane %v326_v27, 1  ;;  %v333_v32 = vmax.f32 %v331_v22, %v332_v28 }
  0x1f   : > { %v2199_v38 = vmax.f32 %v1342_v30, %v1343_v33 }
  0x20   : > { %v328_v36 = vmax.f32 %v326_v27, %v327_v31  ;;  %v334_v37 = vrot.slane %v333_v32, 1  ;;  %v2240_v27 = vand.u32 4294901760, %v857_v19 }
  0x21   : > { %v1347_v41 = vcombine.low %v2197_v35, %v2199_v38 }
  0x22   : > { %v335_v39 = vmax.f32 %v333_v32, %v334_v37  ;;  %v931_v37 = vsub.f32 %v857_v19, %v2240_v27 }
  0x23   : > { %v1349_v44 = vsub.f32 %v2184_v1, %v1347_v41 }
  0x24   : > { %v338_v42 = vcombine.low %v328_v36, %v335_v39 }
  0x25   : > { %v1350_v50 = vmul.f32 1.442695, %v1349_v44  ;;  %v932_v44 = vand.u32 4294901760, %v931_v37 }
  0x26   : > { %vm340_vm1 = vcmp.eq.f32.partialorder %v314_v3, %v338_v42 }
  0x27   : > { %v348_v43 = vsel %vm340_vm1, %v347_v40, 4  ;;  %2094 = vpow2.f32 %v1350_v50 }
  0x28   : > { %v349_v45 = vcombine.high %v348_v43, %v348_v43  ;;  %v350_v46 = vsel %vm321_vm0, %v348_v43, 2147483647  ;;  %v2127_v43 = vmov 1.0  }
  0x29   : > { %v351_v47 = vrot.slane %v350_v46, 4 }
  0x2a   : > { %v360_v48 = vsel %vm321_vm0, %v349_v45, 2147483647 }
  0x2b   : > { %vm352_vm2 = vcmp.lt.s32.totalorder %v350_v46, %v351_v47  ;;  %v361_v49 = vrot.slane %v360_v48, 4 }
  0x2c   : > { %v353_v51 = vsel %vm352_vm2, %v350_v46, %v351_v47 }
  0x2d   : > { %v354_v52 = vrot.slane %v353_v51, 2  ;;  %vm362_vm3 = vcmp.lt.s32.totalorder %v360_v48, %v361_v49 }
  0x2e   : > { %v363_v53 = vsel %vm362_vm3, %v360_v48, %v361_v49  ;;  %v933_v49 = vsub.f32 %v931_v37, %v932_v44 }
  0x2f   : > { %vm355_vm5 = vcmp.lt.s32.totalorder %v353_v51, %v354_v52  ;;  %v364_v54 = vrot.slane %v363_v53, 2 }
  0x30   : > { %v356_v55 = vsel %vm355_vm5, %v353_v51, %v354_v52 }
  0x31   : > { %v357_v56 = vrot.slane %v356_v55, 1  ;;  %vm365_vm6 = vcmp.lt.s32.totalorder %v363_v53, %v364_v54  ;;  %v2095_v5 = vpop.eup %2094 }
  0x32   : > { %v366_v59 = vsel %vm365_vm6, %v363_v53, %v364_v54  ;;  %v1353_v9 = vcombine.high %v2095_v5, %v2095_v5  ;;  %v1354_v22 = vsel %vm321_vm0, %v2095_v5, 0  ;;  %v934_v54 = vand.u32 4294901760, %v933_v49 }
  0x33   : > { %vm358_vm7 = vcmp.lt.s32.totalorder %v356_v55, %v357_v56  ;;  %v367_v60 = vrot.slane %v366_v59, 1  ;;  %v2246_v29 = vand.u32 4294901760, %v1354_v22 }
  0x34   : > { %v359_v61 = vsel %vm358_vm7, %v356_v55, %v357_v56 }
  0x35   : > { %vm368_vm8 = vcmp.lt.s32.totalorder %v366_v59, %v367_v60  ;;  %vm370_vm9 = vcmp.eq.s32.totalorder %v2194_v25, %v359_v61  ;;  %v2257_v39 = vsub.f32 %v1354_v22, %v2246_v29 }
  0x36   : > { %v369_v63 = vsel %vm368_vm8, %v366_v59, %v367_v60  ;;  %v2212_v2 = vsel %vm370_vm9, 1.0, %v2124_v0 }
  0x37   : > { %vm371_vm10 = vcmp.eq.s32.totalorder %v2194_v25, %v369_v63  ;;  %v859_v31 = vsel %vm321_vm0, %v2212_v2, 0  ;;  %v1444_v45 = vand.u32 4294901760, %v2257_v39  ;;  %v2128_v63 = vmov 1966171168  }
  0x38   : > { %v2216_v3 = vsel %vm371_vm10, 1.0, %v2124_v0  ;;  %v2259_v40 = vsub.f32 %v859_v31, %v859_v31 }
  0x39   : > { %v378_v6 = vcombine.low %v2212_v2, %v2216_v3  ;;  %v861_v28 = vsel %vm321_vm0, %v2216_v3, 0  ;;  %v1445_v50 = vsub.f32 %v2257_v39, %v1444_v45 }
  0x3a   : > { %v2253_v34 = vsub.f32 %v861_v28, %v861_v28  ;;  %v949_v46 = vand.u32 4294901760, %v2259_v40 }
  0x3b   : > { %v380_v7 = vmul.f32 %v378_v6, %v2184_v1  ;;  %v1356_v1 = vsel %vm321_vm0, %v1353_v9, 0  ;;  %v1446_v55 = vand.u32 4294901760, %v1445_v50 }
  0x3c   : > { %v2236_v23 = vand.u32 4294901760, %v1356_v1  ;;  %v943_v42 = vand.u32 4294901760, %v2253_v34  ;;  %v950_v51 = vsub.f32 %v2259_v40, %v949_v46 }
  0x3d   : > { %v382_v10 = vcombine.high %v380_v7, %v380_v7  ;;  %v387_v11 = vsel %vm321_vm0, %v380_v7, 0 }
  0x3e   : > { %v393_v12 = vand.u32 4294901760, %v387_v11  ;;  %v2251_v33 = vsub.f32 %v1356_v1, %v2236_v23  ;;  %v944_v48 = vsub.f32 %v2253_v34, %v943_v42  ;;  %v951_v56 = vand.u32 4294901760, %v950_v51 }
  0x3f   : > { %v389_v15 = vsel %vm321_vm0, %v382_v10, 0 }
  0x40   : > { %v391_v16 = vand.u32 4294901760, %v389_v15  ;;  %v476_v17 = vsub.f32 %v387_v11, %v393_v12  ;;  %v1438_v41 = vand.u32 4294901760, %v2251_v33  ;;  %v945_v53 = vand.u32 4294901760, %v944_v48 }
  0x42   : > { %392 = vmatprep.subr.mxu1 %v391_v16  ;;  %629 = vmatprep.subr.mxu0 %v391_v16  ;;  %v470_v20 = vsub.f32 %v389_v15, %v391_v16  ;;  %v477_v21 = vand.u32 4294901760, %v476_v17  ;;  %v1439_v47 = vsub.f32 %v2251_v33, %v1438_v41 }
  0x43   : > { %394 = vmatpush1.msra.mxu1 %v393_v12  ;;  %631 = vmatpush1.msra.mxu0 %v393_v12 }
  0x44   : > { %463 = vmatmul.mubr.f32.vlgmr.msra.gmra.mrb[0].mxu1 %v2231_v18  ;;  %698 = vmatmul.mubr.f32.vlgmr.msra.gmra.mrb[0].mxu0 %v2219_v4  ;;  %v471_v24 = vand.u32 4294901760, %v470_v20  ;;  %v478_v26 = vsub.f32 %v476_v17, %v477_v21  ;;  %v1440_v52 = vand.u32 4294901760, %v1439_v47 }
  0x45   : > { %543 = vmatprep.mubr.f32.mxu1 %v2124_v0  ;;  %774 = vmatprep.mubr.f32.mxu0 %v2124_v0 }
  0x46   : > { %707 = vmatprep.subr.mxu0 %v471_v24  ;;  %v472_v30 = vsub.f32 %v470_v20, %v471_v24  ;;  %v479_v32 = vand.u32 4294901760, %v478_v26  ;;  %v1833_v24 = vld [vmem:[%s2339_s9] sm:$0x3] }
  0x47   : > { %711 = vmatpush1.msra.mxu0 %v477_v21 }
  0x48   : > { %v473_v36 = vand.u32 4294901760, %v472_v30  ;;  %783 = vmatprep.subr.mxu0 %v391_v16 }
  0x4a   : > { %474 = vmatprep.subr.mxu1 %v473_v36 }
  0x4b   : > { %480 = vmatpush1.msra.mxu1 %v479_v32 }
  0x4c   : > { %2018 = vmatmul.mubr.msk.f32.vlgmr.msra.gmra.mrb[0].mxu1 %vm383_vm4, %v2127_v43  ;;  %2019 = vmatmul.mubr.msk.f32.vlgmr.msra.gmra.mrb[0].mxu0 %vm383_vm4, %v2127_v43 }
  0x4d   : > { %785 = vmatpush1.msra.mxu0 %v393_v12  ;;  %553 = vmatprep.subr.mxu1 %v470_v20 }
  0x4e   : > { %556 = vmatpush1.msra.mxu1 %v476_v17  ;;  %619 = vmatprep.mubr.f32.mxu1 %v2124_v0 }
  0x4f   : > { %848 = vmatprep.mubr.f32.mxu0 %v2124_v0  ;;  %2021 = vmatprep.subr.msk.mxu1 %vm321_vm0, %v2216_v3 }
  0x50   : > { %1359 = vmatprep.subr.mxu0 %v2236_v23 }
  0x54   : > { %622 = vmatmul.mubr.f32.vlgmr.msra.gmra.mrb[0].mxu1 %v2208_v62  ;;  %2020 = vmatmul.mubr.msk.f32.vlgmr.msra.gmra.mrb[0].mxu0 %vm383_vm4, %v2127_v43 }
  0x55   : > { %2022 = vmatpush1.msk.msra.mxu1 %vm321_vm0, %v2212_v2  ;;  %929 = vmatprep.mubr.f32.mxu1 %v2124_v0 }
  0x56   : > { %1361 = vmatpush1.msra.mxu0 %v2246_v29  ;;  %1424 = vmatprep.mubr.f32.mxu0 %v2124_v0 }
  0x57   : > { %1441 = vmatprep.subr.mxu0 %v1440_v52  ;;  %946 = vmatprep.subr.mxu1 %v945_v53 }
  0x58   : > { %935 = vmatmul.mubr.f32.vlgmr.msra.gmra.mrb[2].mxu1 %v934_v54  ;;  %1430 = vmatmul.mubr.f32.vlgmr.msra.gmra.mrb[2].mxu0 %v2231_v18 }
  0x59   : > { %1447 = vmatpush1.msra.mxu0 %v1446_v55  ;;  %952 = vmatpush1.msra.mxu1 %v951_v56 }
  0x5a   : > { %1015 = vmatprep.mubr.f32.mxu1 %v2124_v0  ;;  %1510 = vmatprep.mubr.f32.mxu0 %v2124_v0 }
  0x5b   : > { %1520 = vmatprep.subr.mxu0 %v2251_v33  ;;  %1025 = vmatprep.subr.mxu1 %v2253_v34 }
  0x60   : > { %1017 = vmatmul.mubr.f32.vlgmr.msra.gmra.mrb[2].mxu1 %v2240_v27  ;;  %2027 = vmatmul.mubr.msk.f32.vlgmr.msra.gmra.mrb[2].mxu0 %vm383_vm4, %v2127_v43 }
  0x61   : > { %1523 = vmatpush1.msra.mxu0 %v2257_v39  ;;  %1028 = vmatpush1.msra.mxu1 %v2259_v40 }
  0x62   : > { %1091 = vmatprep.mubr.f32.mxu1 %v2124_v0  ;;  %1586 = vmatprep.mubr.f32.mxu0 %v2124_v0 }
  0x63   : > { %1596 = vmatprep.subr.mxu0 %v2236_v23  ;;  %2023 = vmatprep.subr.msk.mxu1 %vm321_vm0, %v2216_v3 }
  0x68   : > { %1094 = vmatmul.mubr.f32.vlgmr.msra.gmra.mrb[2].mxu1 %v931_v37  ;;  %1589 = vmatmul.mubr.f32.vlgmr.msra.gmra.mrb[2].mxu0 %v2208_v62 }
  0x69   : > { %1598 = vmatpush1.msra.mxu0 %v2246_v29  ;;  %2024 = vmatpush1.msk.msra.mxu1 %vm321_vm0, %v2212_v2 }
  0x6a   : > { %1166 = vmatprep.mubr.f32.mxu1 %v2124_v0  ;;  %1661 = vmatprep.mubr.f32.mxu0 %v2124_v0 }
  0x6b   : > { %1674 = vmatprep.subr.mxu0 %v1438_v41  ;;  %1179 = vmatprep.subr.mxu1 %v943_v42 }
  0x70   : > { %1170 = vmatmul.mubr.f32.vlgmr.msra.gmra.mrb[2].mxu1 %v932_v44  ;;  %1665 = vmatmul.mubr.f32.vlgmr.msra.gmra.mrb[2].mxu0 %v2219_v4 }
  0x71   : > { %1678 = vmatpush1.msra.mxu0 %v1444_v45  ;;  %1183 = vmatpush1.msra.mxu1 %v949_v46 }
  0x72   : > { %1246 = vmatprep.mubr.f32.mxu1 %v2124_v0  ;;  %1741 = vmatprep.mubr.f32.mxu0 %v2124_v0 }
  0x73   : > { %1750 = vmatprep.subr.mxu0 %v2236_v23  ;;  %2025 = vmatprep.subr.msk.mxu1 %vm321_vm0, %v2216_v3 }
  0x78   : > { %1248 = vmatmul.mubr.f32.vlgmr.msra.gmra.mrb[2].mxu1 %v2240_v27  ;;  %2028 = vmatmul.mubr.msk.f32.vlgmr.msra.gmra.mrb[2].mxu0 %vm383_vm4, %v2127_v43 }
  0x79   : > { %1752 = vmatpush1.msra.mxu0 %v2246_v29  ;;  %2026 = vmatpush1.msk.msra.mxu1 %vm321_vm0, %v2212_v2  ;;  %v1838_v2 = vunpack.c.l.s4 %v2128_v63 }
  0x7a   : > { %1320 = vmatprep.mubr.f32.mxu1 %v2124_v0  ;;  %1815 = vmatprep.mubr.f32.mxu0 %v2124_v0  ;;  %v1858_v0 = vld [vmem:[%s300_s6] sm:$0x3] }
  0x7b   : > { %v1839_v3 = vunpack.c.0.s8 %v1838_v2 }
  0x7d   : > { %v1842_v6 = vsub.s32 %v1839_v3, %v2194_v25 }
  0x80   : > { %1322 = vmatmul.mubr.f32.vlgmr.msra.gmra.mrb[2].mxu1 %v2240_v27  ;;  %2029 = vmatmul.mubr.msk.f32.vlgmr.msra.gmra.mrb[2].mxu0 %vm383_vm4, %v2127_v43 }
 0x127   : > { %v623_v58 = vpop.f32.mrb[0].mxu1  ;;  %v851_v59 = vpop.f32.mrb[0].mxu0 }
 0x128   : > { %v2034_v13 = vadd.f32 %v851_v59, %v623_v58  ;;  %v625_v60 = vpop.f32.mrb[1].mxu1  ;;  %v853_v61 = vpop.f32.mrb[1].mxu0 }
 0x129   : > { %v2035_v62 = vadd.f32 %v853_v61, %v625_v60 }
 0x153   : > { %v1323_v4 = vpop.f32.mrb[2].mxu1  ;;  %v1818_v5 = vpop.f32.mrb[2].mxu0 }
 0x154   : > { %2096 = vlog2.f32 %v1818_v5  ;;  %v1325_v7 = vpop.f32.mrb[3].mxu1  ;;  %v1820_v8 = vpop.f32.mrb[3].mxu0 }
 0x155   : > { %v1861_v9 = vcombine.low %v1323_v4, %v1325_v7  ;;  %2098 = vlog2.f32 %v1820_v8 }
 0x157   : > { %v1868_v10 = vrot.slane %v1861_v9, %v1842_v6 }
 0x159   : > { %v1875_v11 = vrot.slane %v1868_v10, %v1842_v6 }
 0x15b   : > { %v1877_v12 = vadd.f32 %v1875_v11, %v1858_v0 }
 0x15d   : > { %1878 = vst.msk [vmem:[%s300_s6] sm:$0x3] %vm2329_vm11, %v1877_v12 }
 0x15e   : > { %v2097_v14 = vpop.eup %2096 }
 0x15f   : > { %v2099_v15 = vpop.eup %2098  ;;  %v1824_v16 = vmul.f32 0.6931472, %v2097_v14 }
 0x160   : > { %v1826_v17 = vmul.f32 0.6931472, %v2099_v15 }
 0x161   : > { %v1827_v25 = vadd.f32 %v1824_v16, %v2197_v35 }
 0x162   : > { %v1828_v18 = vadd.f32 %v1826_v17, %v2199_v38 }
 0x163   : > { %v1829_v1 = vsub.f32 %v1827_v25, %v2034_v13 }
 0x164   : > { %v1830_v19 = vsub.f32 %v1828_v18, %v2035_v62 }
 0x165   : > { %v1831_v20 = vmul.f32 %v1829_v1, %v1323_v4 }
 0x166   : > { %v1832_v21 = vmul.f32 %v1830_v19, %v1325_v7 }
 0x168   : > { %v1836_v22 = vcombine.low %v1831_v20, %v1832_v21 }
 0x16a   : > { %v1843_v23 = vrot.slane %v1836_v22, %v1842_v6 }
 0x16c   : > { %v1850_v26 = vrot.slane %v1843_v23, %v1842_v6 }
 0x16e   : > { %v1852_v27 = vadd.f32 %v1850_v26, %v1833_v24 }
 0x170   : > { %1857 = vst.msk [vmem:[%s2339_s9] sm:$0x3] %vm2329_vm11, %v1852_v27 }
 0x171 PF: > { %s15_s17 = sadd.s32 1, %s2122_s17   ;;  %s2370_s15 = smov %s2118_s16 }
 0x172   : > { %p12_p5 = scmp.ge.s32.totalorder %s15_s17, 4   ;;  %s2371_s16 = smov %s2373_s18 }
 0x174   :  { %14 = sbr.rel (!%p12_p5) target bundleno = 2 (0x2), region = 81 }

</bundles_post_ra>
